<compile_context>
chip_gen: v6e
topology: v6e:2x2x1
jax: 0.10.0
libtpu: 0.0.40
codegen_flags: <defaults>
</compile_context>

<pallas_src>
import jax
import jax.numpy as jnp
from jax.experimental import pallas as pl
from jax.experimental.pallas import tpu as pltpu

B, C, H, W = 2, 16, 16, 16     # small NCHW input consistent with the module
_BLOCK_BYTES_BUDGET = 2 * 1024 * 1024   # ~2 MiB/buffer -> <=8 MiB pipelined footprint


def _pick_tile(n, unit_bytes, budget, align):
    """Largest divisor t of n (with t % align == 0, or t == n) s.t. t*unit_bytes <= budget.
    Falls back to the smallest legal tile if nothing fits the budget."""
    cands = [t for t in range(1, n + 1) if n % t == 0 and (t % align == 0 or t == n)]
    fitting = [t for t in cands if t * unit_bytes <= budget]
    return max(fitting) if fitting else min(cands)


def fused_bias_leakyrelu(x_nchw, bias, lrmul=1.0, negative_slope=0.2, scale=2.0 ** 0.5):
    """Pallas TPU implementation of FusedBiasLeakyReLU.forward.

    x_nchw: (B, C, H, W); bias: (C,).  out = scale * leaky_relu(x + bias * lrmul).
    """
    b, c, h, w = x_nchw.shape
    hw = h * w
    itemsize = jnp.dtype(x_nchw.dtype).itemsize

    # Free, contiguous reshapes (no tile op / no extra HBM round-trip for the bias).
    x3 = x_nchw.reshape(b, c, hw)       # lane axis = flattened spatial (256 here, multiple of 128)
    bias3 = bias.reshape(1, c, 1)       # broadcast over batch + lanes happens in-kernel

    # Lane-dense tiles capped at ~_BLOCK_BYTES_BUDGET per buffer.
    thw = _pick_tile(hw, itemsize, _BLOCK_BYTES_BUDGET, 128)          # lane dim: x128 (or full)
    tc = _pick_tile(c, thw * itemsize, _BLOCK_BYTES_BUDGET, 8)        # sublane dim: x8 (or full)
    tb = _pick_tile(b, tc * thw * itemsize, _BLOCK_BYTES_BUDGET, 1)   # batch dim: anything
    grid = (b // tb, c // tc, hw // thw)                              # (1, 1, 1) at the toy size

    neg_scale = negative_slope * scale  # folds at trace time

    def kernel(x_ref, b_ref, o_ref):
        # x_ref: (tb, tc, thw); b_ref: (1, tc, 1); o_ref: (tb, tc, thw).
        v = x_ref[...].astype(jnp.float32) + b_ref[...].astype(jnp.float32) * lrmul
        # One select + one mul (instead of select + two muls); cast on store for
        # bf16 / mixed-dtype robustness.
        o_ref[...] = (v * jnp.where(v >= 0.0, scale, neg_scale)).astype(o_ref.dtype)

    out = pl.pallas_call(
        kernel,
        out_shape=jax.ShapeDtypeStruct((b, c, hw), x_nchw.dtype),
        grid=grid,
        in_specs=[
            pl.BlockSpec((tb, tc, thw), lambda i, j, k: (i, j, k)),
            pl.BlockSpec((1, tc, 1), lambda i, j, k: (0, j, 0)),
        ],
        out_specs=pl.BlockSpec((tb, tc, thw), lambda i, j, k: (i, j, k)),
        # Same-shape/dtype elementwise op: alias the x slab to the output.
        input_output_aliases={0: 0},
        compiler_params=pltpu.CompilerParams(
            dimension_semantics=("parallel", "parallel", "parallel")),
    )(x3, bias3)
    return out.reshape(b, c, h, w)


def reference(x, bias, lrmul=1.0, negative_slope=0.2, scale=2.0 ** 0.5):
    """Pure-JAX NCHW reference mirroring the PyTorch forward."""
    v = x + (bias * lrmul).reshape(1, -1, 1, 1)
    return jnp.where(v >= 0.0, v, negative_slope * v) * scale


if __name__ == "__main__":
    key = jax.random.PRNGKey(0)
    kx, kb = jax.random.split(key)
    x = jax.random.normal(kx, (B, C, H, W), jnp.float32)
    # The module initializes bias to zeros; use nonzero values so the fused
    # bias-broadcast + lrmul path is actually exercised.
    bias = 0.1 * jax.random.normal(kb, (C,), jnp.float32)

    # Compute the reference first (the kernel donates its x slab to the output).
    ref = reference(x, bias)

    out = fused_bias_leakyrelu(x, bias)
    out = jax.block_until_ready(out)

    err = float(jnp.max(jnp.abs(out - ref)))
    assert out.shape == (B, C, H, W)
    assert err < 1e-5, f"max abs err {err}"
    print("KERNEL_OK")
</pallas_src>

<mosaic_0001>
module attributes {stable_mosaic.version = 11 : i64} {
  func.func @kernel(%arg0: i32, %arg1: i32, %arg2: i32, %arg3: memref<2x16x256xf32, #tpu.memory_space<vmem>>, %arg4: memref<1x16x1xf32, #tpu.memory_space<vmem>>, %arg5: memref<2x16x256xf32, #tpu.memory_space<vmem>>) attributes {dimension_semantics = [#tpu.dimension_semantics<parallel>, #tpu.dimension_semantics<parallel>, #tpu.dimension_semantics<parallel>], iteration_bounds = array<i64: 1, 1, 1>, scalar_prefetch = 0 : i64, scratch_operands = 0 : i64, tpu.core_type = #tpu.core_type<tc>, window_params = [{transform_indices = @transform_0, window_bounds = array<i64: 2, 16, 256>}, {transform_indices = @transform_1, window_bounds = array<i64: 1, 16, 1>}, {transform_indices = @transform_2, window_bounds = array<i64: 2, 16, 256>}]} {
    %c0 = arith.constant 0 : index
    %c0_0 = arith.constant 0 : index
    %c0_1 = arith.constant 0 : index
    %0 = vector.load %arg3[%c0, %c0_0, %c0_1] : memref<2x16x256xf32, #tpu.memory_space<vmem>>, vector<2x16x256xf32>
    %c0_2 = arith.constant 0 : index
    %c0_3 = arith.constant 0 : index
    %c0_4 = arith.constant 0 : index
    %1 = vector.load %arg4[%c0_2, %c0_3, %c0_4] : memref<1x16x1xf32, #tpu.memory_space<vmem>>, vector<1x16x1xf32>
    %cst = arith.constant 1.000000e+00 : f32
    %2 = vector.broadcast %cst : f32 to vector<1x16x1xf32>
    %3 = arith.mulf %1, %2 : vector<1x16x1xf32>
    %4 = vector.broadcast %3 : vector<1x16x1xf32> to vector<2x16x256xf32>
    %5 = arith.addf %0, %4 : vector<2x16x256xf32>
    %cst_5 = arith.constant 0.000000e+00 : f32
    %6 = vector.broadcast %cst_5 : f32 to vector<2x16x256xf32>
    %7 = arith.cmpf oge, %5, %6 : vector<2x16x256xf32>
    %cst_6 = arith.constant 1.41421354 : f32
    %cst_7 = arith.constant 0.282842726 : f32
    %8 = vector.broadcast %cst_6 : f32 to vector<2x16x256xf32>
    %9 = vector.broadcast %cst_7 : f32 to vector<2x16x256xf32>
    %10 = arith.select %7, %8, %9 : vector<2x16x256xi1>, vector<2x16x256xf32>
    %11 = arith.mulf %5, %10 : vector<2x16x256xf32>
    %c0_8 = arith.constant 0 : index
    %c0_9 = arith.constant 0 : index
    %c0_10 = arith.constant 0 : index
    %12 = vector.load %arg5[%c0_8, %c0_9, %c0_10] : memref<2x16x256xf32, #tpu.memory_space<vmem>>, vector<2x16x256xf32>
    tpu.vector_store %arg5[%c0_8, %c0_9, %c0_10], %11 {strides = array<i32>} : memref<2x16x256xf32, #tpu.memory_space<vmem>>, vector<2x16x256xf32>,
    return
  }
  func.func @transform_0(%arg0: i32, %arg1: i32, %arg2: i32) -> (i32, i32, i32) {
    %c0_i32 = arith.constant 0 : i32
    return %arg0, %arg1, %arg2 : i32, i32, i32
  }
  func.func @transform_1(%arg0: i32, %arg1: i32, %arg2: i32) -> (i32, i32, i32) {
    %c0_i32 = arith.constant 0 : i32
    %c0_i32_0 = arith.constant 0 : i32
    %c0_i32_1 = arith.constant 0 : i32
    return %c0_i32, %arg1, %c0_i32_0 : i32, i32, i32
  }
  func.func @transform_2(%arg0: i32, %arg1: i32, %arg2: i32) -> (i32, i32, i32) {
    %c0_i32 = arith.constant 0 : i32
    return %arg0, %arg1, %arg2 : i32, i32, i32
  }
}

</mosaic_0001>

<bundles_post_ra>
// kernel: tpu_custom_call.1
= control target key start
LH: loop header
LB: loop body
LE: loop exit
PB: predicated region body
PF: predicated region fallthrough
CT: control target
= control target key end

     0   :  { %7 = vsyncpa [#allocation3], 0  ;;  %s193_s0 = inlined_call_operand.hbm [shape: f32[2,16,256], index: 0, kind: input, shape index: {}, may-alias: {0,2}]   ;;  %s194_s1 = inlined_call_operand.vmem [shape: f32[1,16,1], index: 1, kind: input, shape index: {}]   ;;  %s195_s2 = inlined_call_operand.hbm [shape: f32[2,16,256], index: 2, kind: output, shape index: {}, may-alias: {0,2}]  }
   0x1   :  { %8 = vsyncpa [#allocation4], 0  ;;  %s154_s9 = smov [#allocation2]  }
   0x2   :  { %s14_s10 = sshll.u32 %s154_s9, 4  ;;  %s15_s10 = int_to_ptr.vmem [resolvable:$true] %s14_s10 }
   0x3   :  { %s118_s11 = scalar_lea.vmem %s15_s10, 1024  ;;  %p123_p1 = scmp.lt.s32.totalorder %s15_s10, %s15_s10 }
   0x4   :  { %p119_p0 = scmp.ne.s32.totalorder %s15_s10, %s118_s11  ;;  %p124_p2 = scmp.lt.s32.totalorder %s118_s11, %s118_s11 }
   0x6   :  { %p125_p3 = por %p124_p2, %p123_p1 }
   0x8   :  { %p126_p4 = pnand %p125_p3, %p119_p0 }
   0xa   :  { %129 = shalt.err (!%p126_p4)
}
   0xb   :  { %s155_s12 = smov 256   ;;  %s156_s13 = smov 16  }
   0xc   :  { %20 = dma.hbm_to_vmem [thread:$0]  %s193_s0, 1024, %s15_s10, [#allocation3], %s155_s12, %s155_s12, %s156_s13  }
   0xd   :  { %150 = dma.done.wait [#allocation3], 1024  }
   0xe   :  { %151 = vsyncadd [#allocation3], 4294966272  ;;  %v157_v0 = vmov 0   ;;  %v34_v1 = vld [vmem:[%s194_s1] sm:$0xff]  ;;  %v35_v2 = vld [vmem:[%s194_s1 + $0x8] sm:$0xff]  ;;  %s159_s0 = smov [#allocation5]  }
   0xf   :  { %109 = vset.pattern.permute.xlu0 %v157_v0  ;;  %v26_v3 = vld [vmem:[#allocation2] sm:$0xff]  ;;  %v27_v4 = vld [vmem:[#allocation2 + $0x8] sm:$0xff]  ;;  %v28_v12 = vld [vmem:[#allocation2 + $0x10] sm:$0xff]  ;;  %v158_v16 = vmov 0.28284273   ;;  %s91_s1 = sshll.u32 %s159_s0, 4  ;;  %s92_s1 = int_to_ptr.vmem [resolvable:$true] %s91_s1 }
  0x10   :  { %38 = vperm.xlu0 %109, %v34_v1   ;;  %v30_v5 = vld [vmem:[#allocation2 + $0x20] sm:$0xff]  ;;  %v31_v6 = vld [vmem:[#allocation2 + $0x28] sm:$0xff]  ;;  %v29_v13 = vld [vmem:[#allocation2 + $0x18] sm:$0xff]  ;;  %s130_s20 = scalar_lea.vmem %s92_s1, 1024  ;;  %p135_p6 = scmp.lt.s32.totalorder %s92_s1, %s92_s1 }
  0x11   :  { %v32_v14 = vld [vmem:[#allocation2 + $0x30] sm:$0xff]  ;;  %v33_v15 = vld [vmem:[#allocation2 + $0x38] sm:$0xff]  ;;  %p131_p5 = scmp.ne.s32.totalorder %s92_s1, %s130_s20  ;;  %p136_p7 = scmp.lt.s32.totalorder %s130_s20, %s130_s20 }
  0x13   :  { %p137_p8 = por %p136_p7, %p135_p6 }
  0x14   :  { %43 = vperm.xlu0 %109, %v35_v2  }
  0x15   :  { %p138_p9 = pnand %p137_p8, %p131_p5 }
  0x8b   :  { %v39_v7 = vpop.permute.xlu0 %38 }
  0x8c   :  { %v46_v8 = vadd.f32 %v39_v7, %v26_v3  ;;  %v47_v9 = vadd.f32 %v39_v7, %v27_v4  ;;  %v50_v10 = vadd.f32 %v39_v7, %v30_v5  ;;  %v51_v11 = vadd.f32 %v39_v7, %v31_v6 }
  0x8e   :  { %vm54_vm0 = vcmp.ge.f32.partialorder %v46_v8, 0.0  ;;  %vm55_vm1 = vcmp.ge.f32.partialorder %v47_v9, 0.0  ;;  %vm58_vm2 = vcmp.ge.f32.partialorder %v50_v10, 0.0  ;;  %vm59_vm3 = vcmp.ge.f32.partialorder %v51_v11, 0.0 }
  0x8f   :  { %v62_v17 = vsel %vm54_vm0, 1.4142135, %v158_v16  ;;  %v63_v18 = vsel %vm55_vm1, 1.4142135, %v158_v16  ;;  %v66_v19 = vsel %vm58_vm2, 1.4142135, %v158_v16  ;;  %v44_v20 = vpop.permute.xlu0 %43 }
  0x90   :  { %v67_v21 = vsel %vm59_vm3, 1.4142135, %v158_v16  ;;  %v70_v22 = vmul.f32 %v62_v17, %v46_v8  ;;  %v71_v23 = vmul.f32 %v63_v18, %v47_v9  ;;  %v74_v24 = vmul.f32 %v66_v19, %v50_v10 }
  0x91   :  { %v75_v25 = vmul.f32 %v67_v21, %v51_v11  ;;  %v48_v26 = vadd.f32 %v44_v20, %v28_v12  ;;  %v49_v27 = vadd.f32 %v44_v20, %v29_v13  ;;  %v52_v28 = vadd.f32 %v44_v20, %v32_v14 }
  0x92   :  { %78 = vst [vmem:[#allocation5] sm:$0xff] %v70_v22  ;;  %79 = vst [vmem:[#allocation5 + $0x8] sm:$0xff] %v71_v23  ;;  %v53_v29 = vadd.f32 %v44_v20, %v33_v15 }
  0x93   :  { %82 = vst [vmem:[#allocation5 + $0x20] sm:$0xff] %v74_v24  ;;  %83 = vst [vmem:[#allocation5 + $0x28] sm:$0xff] %v75_v25  ;;  %vm56_vm4 = vcmp.ge.f32.partialorder %v48_v26, 0.0  ;;  %vm57_vm5 = vcmp.ge.f32.partialorder %v49_v27, 0.0  ;;  %vm60_vm6 = vcmp.ge.f32.partialorder %v52_v28, 0.0 }
  0x94   :  { %vm61_vm7 = vcmp.ge.f32.partialorder %v53_v29, 0.0  ;;  %v64_v30 = vsel %vm56_vm4, 1.4142135, %v158_v16  ;;  %v65_v31 = vsel %vm57_vm5, 1.4142135, %v158_v16 }
  0x95   :  { %v68_v32 = vsel %vm60_vm6, 1.4142135, %v158_v16  ;;  %v69_v33 = vsel %vm61_vm7, 1.4142135, %v158_v16  ;;  %v72_v34 = vmul.f32 %v64_v30, %v48_v26  ;;  %v73_v35 = vmul.f32 %v65_v31, %v49_v27 }
  0x96   :  { %v76_v36 = vmul.f32 %v68_v32, %v52_v28  ;;  %v77_v37 = vmul.f32 %v69_v33, %v53_v29 }
  0x97   :  { %80 = vst [vmem:[#allocation5 + $0x10] sm:$0xff] %v72_v34  ;;  %81 = vst [vmem:[#allocation5 + $0x18] sm:$0xff] %v73_v35 }
  0x98   :  { %84 = vst [vmem:[#allocation5 + $0x30] sm:$0xff] %v76_v36  ;;  %85 = vst [vmem:[#allocation5 + $0x38] sm:$0xff] %v77_v37 }
  0x99   :  { %141 = shalt.err (!%p138_p9)
}
  0x9a   :  { %97 = dma.vmem_to_hbm [thread:$0]  %s92_s1, 1024, %s195_s2, [#allocation4], %s155_s12, %s155_s12, %s156_s13  }
  0x9b   :  { %152 = dma.done.wait [#allocation4], 1024  }
  0x9c   :  { %153 = vsyncadd [#allocation4], 4294966272 }
  0x9d   :  { %101 = vsyncpa [#allocation3], 1 }
  0x9e   :  { %102 = vsyncpa [#allocation4], 1 }

</bundles_post_ra>
